<compile_context>
chip_gen: v7x
topology: tpu7x:2x2x1
jax: 0.10.0
libtpu: 0.0.40
codegen_flags: <defaults>
</compile_context>

<pallas_src>
import functools
import math

import jax
import jax.numpy as jnp
import numpy as np
from jax.experimental import pallas as pl
from jax.experimental.pallas import tpu as pltpu


def _sep_spatial_attn_kernel(x_ref, wqkv_ref, bqkv_ref, r_ref, g_ref, p_ref,
                             wo_ref, bo_ref, out_ref, attn_ref,
                             *, num_joints, num_heads):
    """One grid step: `block_b` batch elements, full (S, J*D) slab in VMEM.

    Lane layout of every 128-wide row: feature f = j*D + h*dh + d (joint-major,
    head-major within joint), matching the PyTorch module's head split.
    Fused projection columns: [ q (JD) | k_rep (J*JD) | v_rep (J*JD) ] where
    k_rep/v_rep already have the key joint kk broadcast across query joints j
    (E was folded into the weights in the wrapper).
    """
    Bt, S, JD = x_ref.shape
    J = num_joints
    H = num_heads
    D = JD // J
    rows = Bt * S
    HJJ = H * J * J

    # ---- fused Q / K_rep / V_rep projection: one (rows,128) @ (128,1152) MXU matmul --
    x2 = x_ref[...].reshape(rows, JD).astype(jnp.bfloat16)      # leading-dim merge only
    qkv = jnp.dot(x2, wqkv_ref[...],
                  preferred_element_type=jnp.float32) + bqkv_ref[...]
    q = qkv[:, 0:JD]                                            # already scaled 1/sqrt(dh)

    # ---- scores[r, (h*J+j)*J+kk] = sum_d q[r,j,h,d] * k[r,kk,h,d] ---------------------
    # Accumulated over kk with lane-aligned 128-wide slices; no (rows, J*JD) q_rep copy.
    def score_term(kk):
        k_kk = qkv[:, (1 + kk) * JD:(2 + kk) * JD]              # (rows, 128), lane-aligned
        return jnp.dot((q * k_kk).astype(jnp.bfloat16), r_ref[kk],
                       preferred_element_type=jnp.float32)      # (rows, H*J*J)

    scores = score_term(0)
    for kk in range(1, J):
        scores = scores + score_term(kk)

    # Softmax over the key-joint axis: groups of J consecutive lanes (layout (h,j,kk)).
    # Subtract the per-row max (constant within each group -> softmax unchanged); the
    # clamp guarantees every group keeps a nonzero sum, so denom can never hit 0 -> Inf.
    m = jnp.max(scores, axis=-1, keepdims=True)
    e = jnp.exp(jnp.maximum(scores - m, -60.0))
    denom = jnp.dot(e.astype(jnp.bfloat16), g_ref[...],
                    preferred_element_type=jnp.float32)         # per-group sums
    a = e * pl.reciprocal(denom, approx=True)                   # (rows, H*J*J)

    # ---- context + output projection --------------------------------------------------
    # ctx[r, j*D+h*dh+d] = sum_kk a[r,h,j,kk] * v[r,kk,h,d]; P_kk expands a over d.
    a_bf = a.astype(jnp.bfloat16)

    def ctx_term(kk):
        v_kk = qkv[:, (1 + J + kk) * JD:(2 + J + kk) * JD]      # (rows, 128)
        return v_kk * jnp.dot(a_bf, p_ref[kk],
                              preferred_element_type=jnp.float32)

    ctx = ctx_term(0)
    for kk in range(1, J):
        ctx = ctx + ctx_term(kk)

    y = jnp.dot(ctx.astype(jnp.bfloat16), wo_ref[...],
                preferred_element_type=jnp.float32) + bo_ref[...]
    out_ref[...] = y.reshape(Bt, S, JD)                         # lane-dense (Bt,S,128) store

    # Only the last sequence step of the attention weights is consumed downstream.
    attn_ref[...] = a.reshape(Bt, S, HJJ)[:, S - 1:S, :]        # (Bt, 1, H*J*J)


def _selection_matrices(D, J, H):
    """Constant 0/1 matrices expressing the per-(row, head) attention as lane-dense
    matmuls.  Score/attention column layout: s = (h*J + j)*J + kk."""
    dh = D // H
    JD = J * D
    HJJ = H * J * J
    E = np.zeros((JD, J * JD), np.float32)      # broadcast key/value joint kk across j
    R = np.zeros((J, JD, HJJ), np.float32)      # per-kk: sum over d within each (h, j)
    for kk in range(J):
        for j in range(J):
            for h in range(H):
                for d in range(dh):
                    f = j * D + h * dh + d
                    E[kk * D + h * dh + d, kk * JD + f] = 1.0
                    R[kk, f, (h * J + j) * J + kk] = 1.0
    P = np.transpose(R, (0, 2, 1)).copy()                       # expand a[h,j,kk] over d
    G = np.kron(np.eye(H * J, dtype=np.float32),                # per-group softmax sums
                np.ones((J, J), np.float32))
    return E, R, P, G


def _device_config():
    """Generation-aware tiling / VMEM budget (safe fallback if detection fails)."""
    try:
        kind = jax.devices()[0].device_kind.lower()
    except Exception:
        kind = ""
    if "v7" in kind or "7x" in kind:            # 2 TCs/chip, 64 MiB VMEM per TC
        return {"cores": 2, "vmem_budget": 40 << 20, "max_rows": 1024}
    if "v6" in kind:                            # 1 TC, 128 MiB VMEM
        return {"cores": 1, "vmem_budget": 100 << 20, "max_rows": 4096}
    if "v5" in kind:                            # 1 TC, 128 MiB VMEM (16 MiB scoped default)
        return {"cores": 1, "vmem_budget": 100 << 20, "max_rows": 4096}
    return {"cores": 1, "vmem_budget": 48 << 20, "max_rows": 2048}


def sep_spacial_attention(x, params, *, block_b=None):
    """x: (B, S, J, D) float32.  Returns (output (B,S,J,D), attn_weights (B,H,J,J))."""
    B, S, J, D = x.shape
    H = params['num_heads']
    JD = J * D
    HJJ = H * J * J
    # The lane-dense design assumes J*D fills whole vreg lane widths.
    assert JD % 128 == 0, f"J*D must be a multiple of 128 (got {JD})"
    assert D % H == 0, "d_model must be divisible by num_heads_spacial"
    dh = D // H
    scale = 1.0 / math.sqrt(dh)

    # ---- one-time weight packing (tiny XLA ops, outside the kernel) -------------------
    eye_j = jnp.eye(J, dtype=jnp.float32)
    wq_t = jnp.transpose(params['wq'], (0, 2, 1))                       # (J, D_in, D_out)
    wq_bd = jnp.einsum('jab,jk->jakb', wq_t, eye_j).reshape(JD, JD) * scale
    wk_bd = jnp.einsum('ab,jk->jakb', params['wk'].T, eye_j).reshape(JD, JD)
    wv_bd = jnp.einsum('ab,jk->jakb', params['wv'].T, eye_j).reshape(JD, JD)
    wo_bd = jnp.einsum('ab,jk->jakb', params['wo'].T, eye_j).reshape(JD, JD)

    E, R3, P3, G = _selection_matrices(D, J, H)
    E = jnp.asarray(E)

    # Pre-fuse the kk-broadcast (E) into the K/V projection weights -> (128, (1+2J)*128).
    w_qkv = jnp.concatenate([wq_bd, wk_bd @ E, wv_bd @ E],
                            axis=1).astype(jnp.bfloat16)
    b_qkv = jnp.concatenate([params['bq'].reshape(JD) * scale,
                             jnp.tile(params['bk'], J * J),
                             jnp.tile(params['bv'], J * J)]).reshape(1, (1 + 2 * J) * JD)
    bo2 = jnp.tile(params['bo'], J).reshape(1, JD)

    # 0/1 selection matrices are exact in bf16.
    R3 = jnp.asarray(R3).astype(jnp.bfloat16)
    P3 = jnp.asarray(P3).astype(jnp.bfloat16)
    G = jnp.asarray(G).astype(jnp.bfloat16)
    wo_bf = wo_bd.astype(jnp.bfloat16)

    x_flat = x.reshape(B, S, JD)                                        # lane-dense input

    cfg = _device_config()
    if block_b is None:
        target_steps = 2 * cfg["cores"]          # keep >=2 steps per TensorCore pipelined
        if B >= target_steps:
            block_b = max(1, min(B // target_steps, max(1, cfg["max_rows"] // S)))
        else:
            block_b = 1
    while B % block_b:
        block_b -= 1

    rows = block_b * S
    weight_bytes = 2 * (JD * (1 + 2 * J) * JD + 2 * J * JD * HJJ + HJJ * HJJ + JD * JD)
    io_bytes = block_b * S * JD * 4
    vmem_est = weight_bytes + 4 * io_bytes + rows * 16 * 1024 + (4 << 20)
    vmem_limit = int(min(max(vmem_est, 16 << 20), cfg["vmem_budget"]))

    macs_per_row = (JD * (1 + 2 * J) * JD      # fused projection
                    + J * JD * HJJ             # scores
                    + HJJ * HJJ                # softmax denominators
                    + J * HJJ * JD             # context expansion
                    + JD * JD)                 # output projection
    cost = pl.CostEstimate(flops=int(2 * B * S * macs_per_row),
                           transcendentals=int(B * S * HJJ),
                           bytes_accessed=int(8 * B * S * JD + 4 * B * HJJ + weight_bytes))

    kernel = functools.partial(_sep_spatial_attn_kernel,
                               num_joints=J, num_heads=H)

    out_flat, attn_flat = pl.pallas_call(
        kernel,
        out_shape=(jax.ShapeDtypeStruct((B, S, JD), jnp.float32),
                   jax.ShapeDtypeStruct((B, 1, HJJ), jnp.float32)),
        grid=(B // block_b,),
        in_specs=[
            pl.BlockSpec((block_b, S, JD), lambda b: (b, 0, 0)),        # x
            pl.BlockSpec((JD, (1 + 2 * J) * JD), lambda b: (0, 0)),     # fused QKV weight (bf16)
            pl.BlockSpec((1, (1 + 2 * J) * JD), lambda b: (0, 0)),      # fused QKV bias (f32)
            pl.BlockSpec((J, JD, HJJ), lambda b: (0, 0, 0)),            # R (per-kk score sel)
            pl.BlockSpec((HJJ, HJJ), lambda b: (0, 0)),                 # G (group sums)
            pl.BlockSpec((J, HJJ, JD), lambda b: (0, 0, 0)),            # P (per-kk ctx sel)
            pl.BlockSpec((JD, JD), lambda b: (0, 0)),                   # block-diag Wo (bf16)
            pl.BlockSpec((1, JD), lambda b: (0, 0)),                    # bo (tiled, f32)
        ],
        out_specs=(
            pl.BlockSpec((block_b, S, JD), lambda b: (b, 0, 0)),        # output, lane-dense
            pl.BlockSpec((block_b, 1, HJJ), lambda b: (b, 0, 0)),       # last-step attention
        ),
        compiler_params=pltpu.CompilerParams(
            dimension_semantics=("parallel",),
            vmem_limit_bytes=vmem_limit),
        cost_estimate=cost,
    )(x_flat, w_qkv, b_qkv, R3, G, P3, wo_bf, bo2)

    out = out_flat.reshape(B, S, J, D)
    attn_weights = attn_flat.reshape(B, H, J, J)    # mirrors attention_weights[:, -1]
    return out, attn_weights


def _reference_forward(x, params):
    """Pure-JAX (f32) mirror of the PyTorch forward, for verification."""
    B, S, J, D = x.shape
    H = params['num_heads']
    dh = D // H

    k = jnp.einsum('bsjd,ed->bsje', x, params['wk']) + params['bk']
    v = jnp.einsum('bsjd,ed->bsje', x, params['wv']) + params['bv']
    q = jnp.einsum('bsjd,jed->bsje', x, params['wq']) + params['bq'][None, None, :, :]

    def split_heads(t):  # (B,S,J,D) -> (B,S,H,J,dh)
        return t.reshape(B, S, J, H, dh).transpose(0, 1, 3, 2, 4)

    qh, kh, vh = split_heads(q), split_heads(k), split_heads(v)
    scores = jnp.einsum('bshjd,bshkd->bshjk', qh, kh) / math.sqrt(dh)
    attn = jax.nn.softmax(scores, axis=-1)
    ctx = jnp.einsum('bshjk,bshkd->bshjd', attn, vh)
    ctx = ctx.transpose(0, 1, 3, 2, 4).reshape(B, S, J, D)
    out = jnp.einsum('bsjd,ed->bsje', ctx, params['wo']) + params['bo']
    return out, attn[:, -1]


def _init_params(key, d_model, num_joints, num_heads):
    """Deterministic PyTorch-Linear-style init: W (out, in), b (out)."""
    keys = jax.random.split(key, 8)
    bound = 1.0 / math.sqrt(d_model)

    def u(k, shape):
        return jax.random.uniform(k, shape, jnp.float32, -bound, bound)

    return {
        'num_heads': num_heads,
        'wk': u(keys[0], (d_model, d_model)), 'bk': u(keys[1], (d_model,)),
        'wv': u(keys[2], (d_model, d_model)), 'bv': u(keys[3], (d_model,)),
        'wq': u(keys[4], (num_joints, d_model, d_model)),
        'bq': u(keys[5], (num_joints, d_model)),
        'wo': u(keys[6], (d_model, d_model)), 'bo': u(keys[7], (d_model,)),
    }


if __name__ == "__main__":
    B, S, J, D, H = 2, 8, 4, 32, 4   # batch, seq_len, num_joints, d_model, num_heads_spacial

    key = jax.random.PRNGKey(0)
    k_x, k_p = jax.random.split(key)
    x = jax.random.normal(k_x, (B, S, J, D), jnp.float32)
    params = _init_params(k_p, D, J, H)

    out, attn_w = jax.block_until_ready(sep_spacial_attention(x, params))
    ref_out, ref_attn = _reference_forward(x, params)

    assert out.shape == (B, S, J, D)
    assert attn_w.shape == (B, H, J, J)
    # Tolerance covers bf16 MXU operands (f32 accumulation) + EUP approximate reciprocal
    # in the softmax denominator; the f32 reference above is the ground truth.
    np.testing.assert_allclose(np.asarray(out), np.asarray(ref_out), rtol=1e-2, atol=1e-2)
    np.testing.assert_allclose(np.asarray(attn_w), np.asarray(ref_attn), rtol=1e-2, atol=1e-2)

    print("KERNEL_OK")
</pallas_src>

<mosaic_0001>
module attributes {stable_mosaic.version = 11 : i64} {
  func.func @_sep_spatial_attn_kernel(%arg0: i32, %arg1: memref<1x8x128xf32, #tpu.memory_space<vmem>>, %arg2: memref<128x1152xbf16, #tpu.memory_space<vmem>>, %arg3: memref<1x1152xf32, #tpu.memory_space<vmem>>, %arg4: memref<4x128x64xbf16, #tpu.memory_space<vmem>>, %arg5: memref<64x64xbf16, #tpu.memory_space<vmem>>, %arg6: memref<4x64x128xbf16, #tpu.memory_space<vmem>>, %arg7: memref<128x128xbf16, #tpu.memory_space<vmem>>, %arg8: memref<1x128xf32, #tpu.memory_space<vmem>>, %arg9: memref<1x8x128xf32, #tpu.memory_space<vmem>>, %arg10: memref<1x1x64xf32, #tpu.memory_space<vmem>>) attributes {dimension_semantics = [#tpu.dimension_semantics<parallel>], iteration_bounds = array<i64: 2>, scalar_prefetch = 0 : i64, scratch_operands = 0 : i64, tpu.core_type = #tpu.core_type<tc>, window_params = [{transform_indices = @transform_0, window_bounds = array<i64: 1, 8, 128>}, {pipeline_mode = #tpu.pipeline_mode<synchronous>, transform_indices = @transform_1, window_bounds = array<i64: 128, 1152>}, {pipeline_mode = #tpu.pipeline_mode<synchronous>, transform_indices = @transform_2, window_bounds = array<i64: 1, 1152>}, {pipeline_mode = #tpu.pipeline_mode<synchronous>, transform_indices = @transform_3, window_bounds = array<i64: 4, 128, 64>}, {pipeline_mode = #tpu.pipeline_mode<synchronous>, transform_indices = @transform_4, window_bounds = array<i64: 64, 64>}, {pipeline_mode = #tpu.pipeline_mode<synchronous>, transform_indices = @transform_5, window_bounds = array<i64: 4, 64, 128>}, {pipeline_mode = #tpu.pipeline_mode<synchronous>, transform_indices = @transform_6, window_bounds = array<i64: 128, 128>}, {pipeline_mode = #tpu.pipeline_mode<synchronous>, transform_indices = @transform_7, window_bounds = array<i64: 1, 128>}, {transform_indices = @transform_8, window_bounds = array<i64: 1, 8, 128>}, {transform_indices = @transform_9, window_bounds = array<i64: 1, 1, 64>}]} {
    %c0 = arith.constant 0 : index
    %c0_0 = arith.constant 0 : index
    %c0_1 = arith.constant 0 : index
    %0 = vector.load %arg1[%c0, %c0_0, %c0_1] : memref<1x8x128xf32, #tpu.memory_space<vmem>>, vector<1x8x128xf32>
    %1 = vector.shape_cast %0 : vector<1x8x128xf32> to vector<8x128xf32>
    %2 = arith.truncf %1 : vector<8x128xf32> to vector<8x128xbf16>
    %c0_2 = arith.constant 0 : index
    %c0_3 = arith.constant 0 : index
    %3 = vector.load %arg2[%c0_2, %c0_3] : memref<128x1152xbf16, #tpu.memory_space<vmem>>, vector<128x1152xbf16>
    %cst = arith.constant dense<0.000000e+00> : vector<8x1152xf32>
    %4 = tpu.matmul %2, %3, %cst {dimension_numbers = #tpu.dot_dimension_numbers<[1], [0], [0], [1], [0, 0, 1, 1], [], []>} : vector<8x128xbf16>, vector<128x1152xbf16>, vector<8x1152xf32> -> vector<8x1152xf32>
    %c0_4 = arith.constant 0 : index
    %c0_5 = arith.constant 0 : index
    %5 = vector.load %arg3[%c0_4, %c0_5] : memref<1x1152xf32, #tpu.memory_space<vmem>>, vector<1x1152xf32>
    %6 = vector.broadcast %5 : vector<1x1152xf32> to vector<8x1152xf32>
    %7 = arith.addf %4, %6 : vector<8x1152xf32>
    %8 = vector.extract_strided_slice %7 {offsets = [0, 0], sizes = [8, 128], strides = [1, 1]} : vector<8x1152xf32> to vector<8x128xf32>
    %9 = vector.extract_strided_slice %7 {offsets = [0, 128], sizes = [8, 128], strides = [1, 1]} : vector<8x1152xf32> to vector<8x128xf32>
    %10 = arith.mulf %8, %9 : vector<8x128xf32>
    %11 = arith.truncf %10 : vector<8x128xf32> to vector<8x128xbf16>
    %c0_6 = arith.constant 0 : index
    %c0_7 = arith.constant 0 : index
    %c0_8 = arith.constant 0 : index
    %12 = vector.load %arg4[%c0_6, %c0_7, %c0_8] : memref<4x128x64xbf16, #tpu.memory_space<vmem>>, vector<1x128x64xbf16>
    %13 = vector.shape_cast %12 : vector<1x128x64xbf16> to vector<128x64xbf16>
    %cst_9 = arith.constant dense<0.000000e+00> : vector<8x64xf32>
    %14 = tpu.matmul %11, %13, %cst_9 {dimension_numbers = #tpu.dot_dimension_numbers<[1], [0], [0], [1], [0, 0, 1, 1], [], []>} : vector<8x128xbf16>, vector<128x64xbf16>, vector<8x64xf32> -> vector<8x64xf32>
    %15 = vector.extract_strided_slice %7 {offsets = [0, 256], sizes = [8, 128], strides = [1, 1]} : vector<8x1152xf32> to vector<8x128xf32>
    %16 = arith.mulf %8, %15 : vector<8x128xf32>
    %17 = arith.truncf %16 : vector<8x128xf32> to vector<8x128xbf16>
    %c1 = arith.constant 1 : index
    %c0_10 = arith.constant 0 : index
    %c0_11 = arith.constant 0 : index
    %18 = vector.load %arg4[%c1, %c0_10, %c0_11] : memref<4x128x64xbf16, #tpu.memory_space<vmem>>, vector<1x128x64xbf16>
    %19 = vector.shape_cast %18 : vector<1x128x64xbf16> to vector<128x64xbf16>
    %cst_12 = arith.constant dense<0.000000e+00> : vector<8x64xf32>
    %20 = tpu.matmul %17, %19, %cst_12 {dimension_numbers = #tpu.dot_dimension_numbers<[1], [0], [0], [1], [0, 0, 1, 1], [], []>} : vector<8x128xbf16>, vector<128x64xbf16>, vector<8x64xf32> -> vector<8x64xf32>
    %21 = arith.addf %14, %20 : vector<8x64xf32>
    %22 = vector.extract_strided_slice %7 {offsets = [0, 384], sizes = [8, 128], strides = [1, 1]} : vector<8x1152xf32> to vector<8x128xf32>
    %23 = arith.mulf %8, %22 : vector<8x128xf32>
    %24 = arith.truncf %23 : vector<8x128xf32> to vector<8x128xbf16>
    %c2 = arith.constant 2 : index
    %c0_13 = arith.constant 0 : index
    %c0_14 = arith.constant 0 : index
    %25 = vector.load %arg4[%c2, %c0_13, %c0_14] : memref<4x128x64xbf16, #tpu.memory_space<vmem>>, vector<1x128x64xbf16>
    %26 = vector.shape_cast %25 : vector<1x128x64xbf16> to vector<128x64xbf16>
    %cst_15 = arith.constant dense<0.000000e+00> : vector<8x64xf32>
    %27 = tpu.matmul %24, %26, %cst_15 {dimension_numbers = #tpu.dot_dimension_numbers<[1], [0], [0], [1], [0, 0, 1, 1], [], []>} : vector<8x128xbf16>, vector<128x64xbf16>, vector<8x64xf32> -> vector<8x64xf32>
    %28 = arith.addf %21, %27 : vector<8x64xf32>
    %29 = vector.extract_strided_slice %7 {offsets = [0, 512], sizes = [8, 128], strides = [1, 1]} : vector<8x1152xf32> to vector<8x128xf32>
    %30 = arith.mulf %8, %29 : vector<8x128xf32>
    %31 = arith.truncf %30 : vector<8x128xf32> to vector<8x128xbf16>
    %c3 = arith.constant 3 : index
    %c0_16 = arith.constant 0 : index
    %c0_17 = arith.constant 0 : index
    %32 = vector.load %arg4[%c3, %c0_16, %c0_17] : memref<4x128x64xbf16, #tpu.memory_space<vmem>>, vector<1x128x64xbf16>
    %33 = vector.shape_cast %32 : vector<1x128x64xbf16> to vector<128x64xbf16>
    %cst_18 = arith.constant dense<0.000000e+00> : vector<8x64xf32>
    %34 = tpu.matmul %31, %33, %cst_18 {dimension_numbers = #tpu.dot_dimension_numbers<[1], [0], [0], [1], [0, 0, 1, 1], [], []>} : vector<8x128xbf16>, vector<128x64xbf16>, vector<8x64xf32> -> vector<8x64xf32>
    %35 = arith.addf %28, %34 : vector<8x64xf32>
    %cst_19 = arith.constant dense<0xFF800000> : vector<8xf32>
    %36 = vector.multi_reduction <maximumf>, %35, %cst_19 [1] : vector<8x64xf32> to vector<8xf32>
    %37 = vector.shape_cast %36 : vector<8xf32> to vector<8x1xf32>
    %38 = vector.broadcast %37 : vector<8x1xf32> to vector<8x64xf32>
    %39 = arith.subf %35, %38 : vector<8x64xf32>
    %cst_20 = arith.constant -6.000000e+01 : f32
    %40 = vector.broadcast %cst_20 : f32 to vector<8x64xf32>
    %41 = arith.maximumf %39, %40 : vector<8x64xf32>
    %42 = math.exp %41 : vector<8x64xf32>
    %43 = arith.truncf %42 : vector<8x64xf32> to vector<8x64xbf16>
    %c0_21 = arith.constant 0 : index
    %c0_22 = arith.constant 0 : index
    %44 = vector.load %arg5[%c0_21, %c0_22] : memref<64x64xbf16, #tpu.memory_space<vmem>>, vector<64x64xbf16>
    %cst_23 = arith.constant dense<0.000000e+00> : vector<8x64xf32>
    %45 = tpu.matmul %43, %44, %cst_23 {dimension_numbers = #tpu.dot_dimension_numbers<[1], [0], [0], [1], [0, 0, 1, 1], [], []>} : vector<8x64xbf16>, vector<64x64xbf16>, vector<8x64xf32> -> vector<8x64xf32>
    %46 = tpu.reciprocal %45 {approx = true} : vector<8x64xf32> -> vector<8x64xf32>
    %47 = arith.mulf %42, %46 : vector<8x64xf32>
    %48 = arith.truncf %47 : vector<8x64xf32> to vector<8x64xbf16>
    %49 = vector.extract_strided_slice %7 {offsets = [0, 640], sizes = [8, 128], strides = [1, 1]} : vector<8x1152xf32> to vector<8x128xf32>
    %c0_24 = arith.constant 0 : index
    %c0_25 = arith.constant 0 : index
    %c0_26 = arith.constant 0 : index
    %50 = vector.load %arg6[%c0_24, %c0_25, %c0_26] : memref<4x64x128xbf16, #tpu.memory_space<vmem>>, vector<1x64x128xbf16>
    %51 = vector.shape_cast %50 : vector<1x64x128xbf16> to vector<64x128xbf16>
    %cst_27 = arith.constant dense<0.000000e+00> : vector<8x128xf32>
    %52 = tpu.matmul %48, %51, %cst_27 {dimension_numbers = #tpu.dot_dimension_numbers<[1], [0], [0], [1], [0, 0, 1, 1], [], []>} : vector<8x64xbf16>, vector<64x128xbf16>, vector<8x128xf32> -> vector<8x128xf32>
    %53 = arith.mulf %49, %52 : vector<8x128xf32>
    %54 = vector.extract_strided_slice %7 {offsets = [0, 768], sizes = [8, 128], strides = [1, 1]} : vector<8x1152xf32> to vector<8x128xf32>
    %c1_28 = arith.constant 1 : index
    %c0_29 = arith.constant 0 : index
    %c0_30 = arith.constant 0 : index
    %55 = vector.load %arg6[%c1_28, %c0_29, %c0_30] : memref<4x64x128xbf16, #tpu.memory_space<vmem>>, vector<1x64x128xbf16>
    %56 = vector.shape_cast %55 : vector<1x64x128xbf16> to vector<64x128xbf16>
    %cst_31 = arith.constant dense<0.000000e+00> : vector<8x128xf32>
    %57 = tpu.matmul %48, %56, %cst_31 {dimension_numbers = #tpu.dot_dimension_numbers<[1], [0], [0], [1], [0, 0, 1, 1], [], []>} : vector<8x64xbf16>, vector<64x128xbf16>, vector<8x128xf32> -> vector<8x128xf32>
    %58 = arith.mulf %54, %57 : vector<8x128xf32>
    %59 = arith.addf %53, %58 : vector<8x128xf32>
    %60 = vector.extract_strided_slice %7 {offsets = [0, 896], sizes = [8, 128], strides = [1, 1]} : vector<8x1152xf32> to vector<8x128xf32>
    %c2_32 = arith.constant 2 : index
    %c0_33 = arith.constant 0 : index
    %c0_34 = arith.constant 0 : index
    %61 = vector.load %arg6[%c2_32, %c0_33, %c0_34] : memref<4x64x128xbf16, #tpu.memory_space<vmem>>, vector<1x64x128xbf16>
    %62 = vector.shape_cast %61 : vector<1x64x128xbf16> to vector<64x128xbf16>
    %cst_35 = arith.constant dense<0.000000e+00> : vector<8x128xf32>
    %63 = tpu.matmul %48, %62, %cst_35 {dimension_numbers = #tpu.dot_dimension_numbers<[1], [0], [0], [1], [0, 0, 1, 1], [], []>} : vector<8x64xbf16>, vector<64x128xbf16>, vector<8x128xf32> -> vector<8x128xf32>
    %64 = arith.mulf %60, %63 : vector<8x128xf32>
    %65 = arith.addf %59, %64 : vector<8x128xf32>
    %66 = vector.extract_strided_slice %7 {offsets = [0, 1024], sizes = [8, 128], strides = [1, 1]} : vector<8x1152xf32> to vector<8x128xf32>
    %c3_36 = arith.constant 3 : index
    %c0_37 = arith.constant 0 : index
    %c0_38 = arith.constant 0 : index
    %67 = vector.load %arg6[%c3_36, %c0_37, %c0_38] : memref<4x64x128xbf16, #tpu.memory_space<vmem>>, vector<1x64x128xbf16>
    %68 = vector.shape_cast %67 : vector<1x64x128xbf16> to vector<64x128xbf16>
    %cst_39 = arith.constant dense<0.000000e+00> : vector<8x128xf32>
    %69 = tpu.matmul %48, %68, %cst_39 {dimension_numbers = #tpu.dot_dimension_numbers<[1], [0], [0], [1], [0, 0, 1, 1], [], []>} : vector<8x64xbf16>, vector<64x128xbf16>, vector<8x128xf32> -> vector<8x128xf32>
    %70 = arith.mulf %66, %69 : vector<8x128xf32>
    %71 = arith.addf %65, %70 : vector<8x128xf32>
    %72 = arith.truncf %71 : vector<8x128xf32> to vector<8x128xbf16>
    %c0_40 = arith.constant 0 : index
    %c0_41 = arith.constant 0 : index
    %73 = vector.load %arg7[%c0_40, %c0_41] : memref<128x128xbf16, #tpu.memory_space<vmem>>, vector<128x128xbf16>
    %cst_42 = arith.constant dense<0.000000e+00> : vector<8x128xf32>
    %74 = tpu.matmul %72, %73, %cst_42 {dimension_numbers = #tpu.dot_dimension_numbers<[1], [0], [0], [1], [0, 0, 1, 1], [], []>} : vector<8x128xbf16>, vector<128x128xbf16>, vector<8x128xf32> -> vector<8x128xf32>
    %c0_43 = arith.constant 0 : index
    %c0_44 = arith.constant 0 : index
    %75 = vector.load %arg8[%c0_43, %c0_44] : memref<1x128xf32, #tpu.memory_space<vmem>>, vector<1x128xf32>
    %76 = vector.broadcast %75 : vector<1x128xf32> to vector<8x128xf32>
    %77 = arith.addf %74, %76 : vector<8x128xf32>
    %78 = vector.shape_cast %77 : vector<8x128xf32> to vector<1x8x128xf32>
    %c0_45 = arith.constant 0 : index
    %c0_46 = arith.constant 0 : index
    %c0_47 = arith.constant 0 : index
    %79 = vector.load %arg9[%c0_45, %c0_46, %c0_47] : memref<1x8x128xf32, #tpu.memory_space<vmem>>, vector<1x8x128xf32>
    tpu.vector_store %arg9[%c0_45, %c0_46, %c0_47], %78 {strides = array<i32>} : memref<1x8x128xf32, #tpu.memory_space<vmem>>, vector<1x8x128xf32>,
    %80 = vector.shape_cast %47 : vector<8x64xf32> to vector<1x8x64xf32>
    %81 = vector.extract_strided_slice %80 {offsets = [0, 7, 0], sizes = [1, 1, 64], strides = [1, 1, 1]} : vector<1x8x64xf32> to vector<1x1x64xf32>
    %c0_48 = arith.constant 0 : index
    %c0_49 = arith.constant 0 : index
    %c0_50 = arith.constant 0 : index
    %82 = vector.load %arg10[%c0_48, %c0_49, %c0_50] : memref<1x1x64xf32, #tpu.memory_space<vmem>>, vector<1x1x64xf32>
    tpu.vector_store %arg10[%c0_48, %c0_49, %c0_50], %81 {strides = array<i32>} : memref<1x1x64xf32, #tpu.memory_space<vmem>>, vector<1x1x64xf32>,
    return
  }
  func.func @transform_0(%arg0: i32) -> (i32, i32, i32) {
    %c0_i32 = arith.constant 0 : i32
    %c0_i32_0 = arith.constant 0 : i32
    %c0_i32_1 = arith.constant 0 : i32
    return %arg0, %c0_i32, %c0_i32_0 : i32, i32, i32
  }
  func.func @transform_1(%arg0: i32) -> (i32, i32) {
    %c0_i32 = arith.constant 0 : i32
    %c0_i32_0 = arith.constant 0 : i32
    %c0_i32_1 = arith.constant 0 : i32
    return %c0_i32, %c0_i32_0 : i32, i32
  }
  func.func @transform_2(%arg0: i32) -> (i32, i32) {
    %c0_i32 = arith.constant 0 : i32
    %c0_i32_0 = arith.constant 0 : i32
    %c0_i32_1 = arith.constant 0 : i32
    return %c0_i32, %c0_i32_0 : i32, i32
  }
  func.func @transform_3(%arg0: i32) -> (i32, i32, i32) {
    %c0_i32 = arith.constant 0 : i32
    %c0_i32_0 = arith.constant 0 : i32
    %c0_i32_1 = arith.constant 0 : i32
    %c0_i32_2 = arith.constant 0 : i32
    return %c0_i32, %c0_i32_0, %c0_i32_1 : i32, i32, i32
  }
  func.func @transform_4(%arg0: i32) -> (i32, i32) {
    %c0_i32 = arith.constant 0 : i32
    %c0_i32_0 = arith.constant 0 : i32
    %c0_i32_1 = arith.constant 0 : i32
    return %c0_i32, %c0_i32_0 : i32, i32
  }
  func.func @transform_5(%arg0: i32) -> (i32, i32, i32) {
    %c0_i32 = arith.constant 0 : i32
    %c0_i32_0 = arith.constant 0 : i32
    %c0_i32_1 = arith.constant 0 : i32
    %c0_i32_2 = arith.constant 0 : i32
    return %c0_i32, %c0_i32_0, %c0_i32_1 : i32, i32, i32
  }
  func.func @transform_6(%arg0: i32) -> (i32, i32) {
    %c0_i32 = arith.constant 0 : i32
    %c0_i32_0 = arith.constant 0 : i32
    %c0_i32_1 = arith.constant 0 : i32
    return %c0_i32, %c0_i32_0 : i32, i32
  }
  func.func @transform_7(%arg0: i32) -> (i32, i32) {
    %c0_i32 = arith.constant 0 : i32
    %c0_i32_0 = arith.constant 0 : i32
    %c0_i32_1 = arith.constant 0 : i32
    return %c0_i32, %c0_i32_0 : i32, i32
  }
  func.func @transform_8(%arg0: i32) -> (i32, i32, i32) {
    %c0_i32 = arith.constant 0 : i32
    %c0_i32_0 = arith.constant 0 : i32
    %c0_i32_1 = arith.constant 0 : i32
    return %arg0, %c0_i32, %c0_i32_0 : i32, i32, i32
  }
  func.func @transform_9(%arg0: i32) -> (i32, i32, i32) {
    %c0_i32 = arith.constant 0 : i32
    %c0_i32_0 = arith.constant 0 : i32
    %c0_i32_1 = arith.constant 0 : i32
    return %arg0, %c0_i32, %c0_i32_0 : i32, i32, i32
  }
}

</mosaic_0001>

<bundles_post_ra>
// kernel: tpu_custom_call.1
= control target key start
LH: loop header
LB: loop body
LE: loop exit
PB: predicated region body
PF: predicated region fallthrough
CT: control target
= control target key end

     0   :  { %s3528_s0 = inlined_call_operand.vmem [shape: f32[2,8,128], index: 0, kind: input, shape index: {}]   ;;  %s3529_s1 = inlined_call_operand.hbm [shape: bf16[128,1152], index: 1, kind: input, shape index: {}]   ;;  %s3530_s2 = inlined_call_operand.vmem [shape: f32[1,1152], index: 2, kind: input, shape index: {}]   ;;  %s3531_s3 = inlined_call_operand.vmem [shape: bf16[4,128,64], index: 3, kind: input, shape index: {}]   ;;  %s3532_s4 = inlined_call_operand.vmem [shape: bf16[64,64], index: 4, kind: input, shape index: {}]   ;;  %s3533_s5 = inlined_call_operand.vmem [shape: bf16[4,64,128], index: 5, kind: input, shape index: {}]   ;;  %s3534_s6 = inlined_call_operand.vmem [shape: bf16[128,128], index: 6, kind: input, shape index: {}]   ;;  %s3535_s7 = inlined_call_operand.vmem [shape: f32[1,128], index: 7, kind: input, shape index: {}]   ;;  %s3536_s8 = inlined_call_operand.hbm [shape: f32[2,8,128], index: 8, kind: output, shape index: {0}]   ;;  %s3537_s9 = inlined_call_operand.hbm [shape: f32[2,1,64], index: 9, kind: output, shape index: {1}]  }
   0x1   :  { %3541 = sst [smem:[#allocation11_spill]] %s3528_s0 }
   0x2   :  { %15 = vsyncpa [#allocation3], 0 }
   0x3   :  { %16 = vsyncpa [#allocation4], 0 }
   0x4   :  { %18 = vsyncpa [#allocation4 + $0x1], 0 }
   0x5   :  { %19 = vsyncpa [#allocation7], 0 }
   0x6   :  { %21 = vsyncpa [#allocation7 + $0x1], 0  ;;  %s3028_s30 = smov 0   ;;  %s3030_s10 = smov 0  }
   0x7   :  { %s3032_s11 = smov 0   ;;  %s3034_s12 = smov 0  }
   0x8 LB: > { %s3049_s13 = sadd.s32 4294967295, %s2968_s12   ;;  %s2119_s14 = sadd.s32 4294967294, %s2968_s12   ;;  %s2968_s12 = sphi %s3034_s12, %s3555_s12   ;;  %s2964_s11 = sphi %s3032_s11, %s3554_s11   ;;  %s2960_s10 = sphi %s3030_s10, %s3553_s10   ;;  %s2956_s30 = sphi %s3028_s30, %s3552_s30  }
   0x9   : > { %s3053_s15 = sadd.s32 1, %s2968_s12   ;;  %s207_s16 = sadd.s32 1, %s2964_s11 }
   0xa   : > { %s204_s17 = ssub.s32 %s2968_s12, %s3053_s15  ;;  %p217_p0 = scmp.ne.s32.totalorder %s2964_s11, %s2960_s10 }
   0xb   : > { %p205_p1 = scmp.eq.s32.totalorder %s204_s17, 0  ;;  %p218_p2 = scmp.eq.s32.totalorder %s3049_s13, 1 }
   0xc   : > { %p223_p3 = scmp.ne.s32.totalorder %s2960_s10, %s2956_s30  ;;  %p224_p4 = scmp.eq.s32.totalorder %s2119_s14, 1 }
   0xd   : > { %s3064_s18 = scalar_select %p205_p1, %s2964_s11, %s207_s16  }
   0xe   : > { %p3066_p5 = por %p218_p2, %p217_p0  ;;  %p3070_p6 = por %p224_p4, %p223_p3 }
   0xf   : > { %p2120_p7 = scmp.ge.s32.totalorder %s2968_s12, 1  ;;  %p257_p8 = scmp.lt.s32.totalorder %s2968_s12, 3 }
  0x10   : > { %s3542_s19 = scalar_select %p3066_p5, 1, 0 }
  0x11   : > { %s3543_s20 = scalar_select %p3070_p6, 1, 0 }
  0x12   : > { %p3538_p9 = scmp.eq.s32.totalorder %s3049_s13, 0  ;;  %p3077_p10 = pnand %p2120_p7, %p257_p8 }
  0x13   : > { %s2970_s22 = smov [#allocation2]   ;;  %s2842_s27 = scalar_lea.hbm %s3529_s1, 9216 }
  0x14   : > { %s3544_s21 = scalar_select %p3077_p10, 1, 0 }
  0x15   : > { %s269_s23 = sshll.u32 %s2970_s22, 4  ;;  %p2622_p11 = pneg %p3077_p10  ;;  %s270_s23 = int_to_ptr.vmem [resolvable:$true] %s269_s23 }
  0x16   : > { %p2843_p13 = scmp.ne.s32.totalorder %s3529_s1, %s2842_s27  ;;  %p2849_p3 = scmp.lt.u32.totalorder %s2842_s27, %s3529_s1 }
  0x17   : > { %p3085_p12 = pnand %p3538_p9, %p2622_p11 }
  0x19   : > { %p2844_p0 = pneg %p3085_p12 }
  0x1b   : > { %p2845_p1 = pnand %p2844_p0, %p2843_p13 }
  0x1d   : > { %p2846_p2 = pneg %p2845_p1 }
  0x1f   : > { %p2851_p4 = pnand %p2849_p3, %p2846_p2 }
  0x21   : > { %2854 = shalt.err (!%p2851_p4)
}
  0x22   : > { %s2855_s17 = scalar_lea.vmem %s270_s23, 9216  ;;  %p2863_p9 = scmp.lt.s32.totalorder %s270_s23, %s270_s23 }
  0x23   : > { %p2856_p7 = scmp.ne.s32.totalorder %s270_s23, %s2855_s17  ;;  %p2864_p6 = scmp.lt.s32.totalorder %s2855_s17, %s2855_s17 }
  0x25   : > { %p2858_p8 = pnand %p2856_p7, %p2844_p0  ;;  %p2865_p5 = por %p2864_p6, %p2863_p9 }
  0x27   : > { %p2859_p11 = pneg %p2858_p8 }
  0x29   : > { %p2866_p10 = pnand %p2865_p5, %p2859_p11 }
  0x2b   : > { %2869 = shalt.err (!%p2866_p10)
}
  0x2c   : > { %s2971_s22 = smov 576   ;;  %s2972_s25 = smov 36  }
  0x2d   : > { %2625 = dma.hbm_to_vmem [thread:$0]  (!%p3085_p12), %s3529_s1, 9216, %s270_s23, [#allocation3], %s2971_s22, %s2971_s22, %s2972_s25  }
  0x2e   : > { %p3546_p13 = scmp.ne.s32.totalorder %s3544_s21, 0 }
  0x2f   : > { %p3547_p1 = scmp.eq.s32.totalorder (!%p3546_p13), %s3049_s13, 0 }
  0x30   : > { %310 = sbr.rel (%p3546_p13) target bundleno = 1499 (0x5db), region = 52 }
  0x37   : > { %2943 = dma.done.wait (%p3547_p1), [#allocation3], 9216   ;;  %p3548_p0 = pmov %p3547_p1 }
  0x38   : > { %v2973_v0 = vmov 0   ;;  %v2674_v1 = vld [vmem:[#allocation2 + $0x4] ss:$36 sps:$4 sm:$0xff]   ;;  %v2676_v2 = vld [vmem:[#allocation2 + $0xc] ss:$36 sps:$4 sm:$0xff]   ;;  %p349_p5 = scmp.lt.s32.totalorder %s3049_s13, 1 }
  0x39   : > { %2945 = vsyncadd (%p3548_p0), [#allocation3], 4294958080  ;;  %885 = vmatprep.mubr.bf16.mxu0 %v2973_v0  ;;  %926 = vmatprep.mubr.bf16.mxu1 %v2973_v0  ;;  %v2678_v3 = vld [vmem:[#allocation2] ss:$36 sps:$4 sm:$0xff]   ;;  %v2679_v4 = vld [vmem:[#allocation2 + $0x8] ss:$36 sps:$4 sm:$0xff]  }
  0x3a   : > { %853 = vmatprep.subr.bf16.mxu0 %v2674_v1  ;;  %894 = vmatprep.subr.bf16.mxu1 %v2676_v2  ;;  %v2680_v5 = vld [vmem:[#allocation2 + $0x4c] ss:$36 sps:$4 sm:$0xff]   ;;  %v2682_v6 = vld [vmem:[#allocation2 + $0x54] ss:$36 sps:$4 sm:$0xff]   ;;  %v2688_v10 = vld [vmem:[#allocation2 + $0x9c] ss:$36 sps:$4 sm:$0xff]  }
  0x3b   : > { %854 = vmatpush1.bf16.msra.mxu0 %v2678_v3  ;;  %895 = vmatpush1.bf16.msra.mxu1 %v2679_v4  ;;  %v2684_v7 = vld [vmem:[#allocation2 + $0x48] ss:$36 sps:$4 sm:$0xff]   ;;  %v2685_v8 = vld [vmem:[#allocation2 + $0x50] ss:$36 sps:$4 sm:$0xff]   ;;  %v2691_v12 = vld [vmem:[#allocation2 + $0x98] ss:$36 sps:$4 sm:$0xff]  }
  0x3c   : > { %855 = vmatprep.subr.bf16.mxu0 %v2680_v5  ;;  %896 = vmatprep.subr.bf16.mxu1 %v2682_v6  ;;  %v2686_v9 = vld [vmem:[#allocation2 + $0x94] ss:$36 sps:$4 sm:$0xff]   ;;  %v2692_v13 = vld [vmem:[#allocation2 + $0xdc] ss:$36 sps:$4 sm:$0xff]   ;;  %v2694_v14 = vld [vmem:[#allocation2 + $0xe4] ss:$36 sps:$4 sm:$0xff]  }
  0x3d   : > { %v2690_v11 = vld [vmem:[#allocation2 + $0x90] ss:$36 sps:$4 sm:$0xff]   ;;  %v2696_v15 = vld [vmem:[#allocation2 + $0xd8] ss:$36 sps:$4 sm:$0xff]   ;;  %v2697_v16 = vld [vmem:[#allocation2 + $0xe0] ss:$36 sps:$4 sm:$0xff]  }
  0x3e   : > { %v2698_v17 = vld [vmem:[#allocation2 + $0x124] ss:$36 sps:$4 sm:$0xff]   ;;  %v2700_v18 = vld [vmem:[#allocation2 + $0x12c] ss:$36 sps:$4 sm:$0xff]   ;;  %v2706_v22 = vld [vmem:[#allocation2 + $0x174] ss:$36 sps:$4 sm:$0xff]  }
  0x3f   : > { %856 = vmatpush1.bf16.msra.mxu0 %v2684_v7  ;;  %897 = vmatpush1.bf16.msra.mxu1 %v2685_v8  ;;  %v2702_v19 = vld [vmem:[#allocation2 + $0x120] ss:$36 sps:$4 sm:$0xff]   ;;  %v2703_v20 = vld [vmem:[#allocation2 + $0x128] ss:$36 sps:$4 sm:$0xff]   ;;  %s350_s21 = scalar_select %p349_p5, %s3049_s13, 1  ;;  %v2974_v4 = vmov 0.0  }
  0x40   : > { %857 = vmatprep.subr.bf16.mxu0 %v2686_v9  ;;  %898 = vmatprep.subr.bf16.mxu1 %v2688_v10  ;;  %v2704_v21 = vld [vmem:[#allocation2 + $0x16c] ss:$36 sps:$4 sm:$0xff]   ;;  %v2710_v25 = vld [vmem:[#allocation2 + $0x1b4] ss:$36 sps:$4 sm:$0xff]   ;;  %v2712_v26 = vld [vmem:[#allocation2 + $0x1bc] ss:$36 sps:$4 sm:$0xff]  }
  0x41   : > { %v2708_v23 = vld [vmem:[#allocation2 + $0x168] ss:$36 sps:$4 sm:$0xff]   ;;  %v2709_v24 = vld [vmem:[#allocation2 + $0x170] ss:$36 sps:$4 sm:$0xff]   ;;  %s2126_s23 = sshll.u32 %s350_s21, 3  ;;  %s3549_s0 = sld [smem:[#allocation11_spill]] }
  0x42   : > { %v2714_v27 = vld [vmem:[#allocation2 + $0x1b0] ss:$36 sps:$4 sm:$0xff]   ;;  %v2715_v28 = vld [vmem:[#allocation2 + $0x1b8] ss:$36 sps:$4 sm:$0xff]   ;;  %v2718_v30 = vld [vmem:[#allocation2 + $0x204] ss:$36 sps:$4 sm:$0xff]  }
  0x43   : > { %858 = vmatpush1.bf16.msra.mxu0 %v2690_v11  ;;  %899 = vmatpush1.bf16.msra.mxu1 %v2691_v12  ;;  %v2716_v29 = vld [vmem:[#allocation2 + $0x1fc] ss:$36 sps:$4 sm:$0xff]   ;;  %v2724_v34 = vld [vmem:[#allocation2 + $0x14] ss:$36 sps:$4 sm:$0xff]   ;;  %v2751_v40 = vld [vmem:[#allocation2 + $0x64] ss:$36 sps:$4 sm:$0xff]   ;;  %v440_v12 = vlaneseq }
  0x44   : > { %859 = vmatprep.subr.bf16.mxu0 %v2692_v13  ;;  %900 = vmatprep.subr.bf16.mxu1 %v2694_v14  ;;  %v2720_v31 = vld [vmem:[#allocation2 + $0x1f8] ss:$36 sps:$4 sm:$0xff]   ;;  %v2721_v32 = vld [vmem:[#allocation2 + $0x200] ss:$36 sps:$4 sm:$0xff]   ;;  %v2722_v36 = vld [vmem:[#allocation2 + $0x10] ss:$36 sps:$4 sm:$0xff]  }
  0x45   : > { %v2727_v37 = vld [vmem:[#allocation2 + $0x5c] ss:$36 sps:$4 sm:$0xff]   ;;  %v2730_v42 = vld [vmem:[#allocation2 + $0xa4] ss:$36 sps:$4 sm:$0xff]   ;;  %v2754_v44 = vld [vmem:[#allocation2 + $0xac] ss:$36 sps:$4 sm:$0xff]  }
  0x46   : > { %v2748_v38 = vld [vmem:[#allocation2 + $0x1c] ss:$36 sps:$4 sm:$0xff]   ;;  %v2733_v46 = vld [vmem:[#allocation2 + $0xec] ss:$36 sps:$4 sm:$0xff]   ;;  %v2757_v48 = vld [vmem:[#allocation2 + $0xf4] ss:$36 sps:$4 sm:$0xff]  }
  0x47   : > { %860 = vmatpush1.bf16.msra.mxu0 %v2696_v15  ;;  %901 = vmatpush1.bf16.msra.mxu1 %v2697_v16  ;;  %s352_s29 = scalar_lea.vmem %s3549_s0, %s2126_s23  ;;  %v2746_v39 = vld [vmem:[#allocation2 + $0x18] ss:$36 sps:$4 sm:$0xff]   ;;  %v2749_v43 = vld [vmem:[#allocation2 + $0x60] ss:$36 sps:$4 sm:$0xff]   ;;  %v2752_v47 = vld [vmem:[#allocation2 + $0xa8] ss:$36 sps:$4 sm:$0xff]  }
  0x48   : > { %861 = vmatprep.subr.bf16.mxu0 %v2698_v17  ;;  %902 = vmatprep.subr.bf16.mxu1 %v2700_v18  ;;  %v354_v33 = vld [vmem:[%s352_s29] sm:$0xff]  ;;  %v2725_v41 = vld [vmem:[#allocation2 + $0x58] ss:$36 sps:$4 sm:$0xff]   ;;  %v2731_v49 = vld [vmem:[#allocation2 + $0xe8] ss:$36 sps:$4 sm:$0xff]   ;;  %vm2975_vm0 = vmmov 0  }
  0x49   : > { %v3118_v35 = vpack.c.bf16 %v354_v33, %v354_v33  ;;  %v2728_v45 = vld [vmem:[#allocation2 + $0xa0] ss:$36 sps:$4 sm:$0xff]   ;;  %v2736_v50 = vld [vmem:[#allocation2 + $0x134] ss:$36 sps:$4 sm:$0xff]   ;;  %v2766_v60 = vld [vmem:[#allocation2 + $0x1cc] ss:$36 sps:$4 sm:$0xff]  }
  0x4a   : > { %v2734_v51 = vld [vmem:[#allocation2 + $0x130] ss:$36 sps:$4 sm:$0xff]   ;;  %v2760_v53 = vld [vmem:[#allocation2 + $0x13c] ss:$36 sps:$4 sm:$0xff]   ;;  %v2763_v57 = vld [vmem:[#allocation2 + $0x184] ss:$36 sps:$4 sm:$0xff]  }
  0x4b   : > { %862 = vmatpush1.bf16.msra.mxu0 %v2702_v19  ;;  %903 = vmatpush1.bf16.msra.mxu1 %v2703_v20  ;;  %v2755_v52 = vld [vmem:[#allocation2 + $0xf0] ss:$36 sps:$4 sm:$0xff]   ;;  %v2739_v54 = vld [vmem:[#allocation2 + $0x17c] ss:$36 sps:$4 sm:$0xff]   ;;  %v2742_v58 = vld [vmem:[#allocation2 + $0x1c4] ss:$36 sps:$4 sm:$0xff]  }
  0x4c   : > { %863 = vmatprep.subr.bf16.mxu0 %v2704_v21  ;;  %904 = vmatprep.subr.bf16.mxu1 %v2706_v22  ;;  %v2758_v55 = vld [vmem:[#allocation2 + $0x138] ss:$36 sps:$4 sm:$0xff]   ;;  %v2761_v59 = vld [vmem:[#allocation2 + $0x180] ss:$36 sps:$4 sm:$0xff]   ;;  %v2745_v62 = vld [vmem:[#allocation2 + $0x20c] ss:$36 sps:$4 sm:$0xff]  }
  0x4d   : > { %v2737_v56 = vld [vmem:[#allocation2 + $0x178] ss:$36 sps:$4 sm:$0xff]   ;;  %v2740_v61 = vld [vmem:[#allocation2 + $0x1c0] ss:$36 sps:$4 sm:$0xff]   ;;  %v2764_v63 = vld [vmem:[#allocation2 + $0x1c8] ss:$36 sps:$4 sm:$0xff]  }
  0x4e   : > { %v2743_v1 = vld [vmem:[#allocation2 + $0x208] ss:$36 sps:$4 sm:$0xff]   ;;  %v2767_v2 = vld [vmem:[#allocation2 + $0x210] ss:$36 sps:$4 sm:$0xff]   ;;  %v2770_v3 = vld [vmem:[%s3531_s3 + $0x40] sm:$0xff]   ;;  %v3164_v13 = vshrl.u32 %v440_v12, 7 }
  0x4f   : > { %864 = vmatpush1.bf16.msra.mxu0 %v2708_v23  ;;  %905 = vmatpush1.bf16.msra.mxu1 %v2709_v24  ;;  %v2771_v5 = vld [vmem:[%s3531_s3 + $0x48] sm:$0xff]   ;;  %v2772_v6 = vld [vmem:[%s3531_s3 + $0x50] sm:$0xff]   ;;  %v2773_v7 = vld [vmem:[%s3531_s3 + $0x58] sm:$0xff]   ;;  %vm1486_vm1 = vcmask 523264   ;;  %s3342_s27 = sand.u32 1, %s2960_s10   ;;  %vm1987_vm2 = vcmask 523271  }
  0x50   : > { %865 = vmatprep.subr.bf16.mxu0 %v2710_v25  ;;  %906 = vmatprep.subr.bf16.mxu1 %v2712_v26  ;;  %v2774_v8 = vld [vmem:[%s3531_s3 + $0x60] sm:$0xff]   ;;  %v2775_v9 = vld [vmem:[%s3531_s3 + $0x68] sm:$0xff]   ;;  %v2776_v10 = vld [vmem:[%s3531_s3 + $0x70] sm:$0xff]   ;;  %v442_v14 = vsub.s32 0, %v3164_v13  ;;  %v450_v15 = vsub.s32 2, %v3164_v13  ;;  %v446_v17 = vsub.s32 1, %v3164_v13 }
  0x51   : > { %v2777_v11 = vld [vmem:[%s3531_s3 + $0x78] sm:$0xff]   ;;  %v3171_v16 = vld [vmem:[%s3530_s2] sm:$0xff]  ;;  %v454_v18 = vsub.s32 3, %v3164_v13  ;;  %v2799_v12 = vld [vmem:[%s3531_s3 + $0xe8] sm:$0xff]   ;;  %s348_s16 = scalar_lea.vmem [#allocation6], %s3342_s27  ;;  %s2340_s17 = sshll.u32 %s3049_s13, 4 }
  0x52   : > { %v443_v19 = vrot.slane %v3171_v16, %v442_v14  ;;  %v451_v20 = vrot.slane %v3171_v16, %v450_v15  ;;  %v447_v21 = vrot.slane %v3171_v16, %v446_v17  ;;  %v2800_v14 = vld [vmem:[%s3531_s3 + $0xf0] sm:$0xff]   ;;  %v2801_v15 = vld [vmem:[%s3531_s3 + $0xf8] sm:$0xff]   ;;  %s2020_s22 = sshll.u32 %s348_s16, 4  ;;  %s3457_s28 = scalar_lea.hbm %s3537_s9, %s2340_s17  ;;  %s2021_s22 = int_to_ptr.vmem [resolvable:$true] %s2020_s22 }
  0x53   : > { %866 = vmatpush1.bf16.msra.mxu0 %v2714_v27  ;;  %907 = vmatpush1.bf16.msra.mxu1 %v2715_v28  ;;  %v455_v22 = vrot.slane %v3171_v16, %v454_v18  ;;  %v2802_v18 = vld [vmem:[#allocation2 + $0x20] ss:$36 sps:$4 sm:$0xff]   ;;  %s1995_s21 = scalar_lea.sflag [#allocation7], %s3342_s27  ;;  %s2870_s23 = scalar_lea.vmem %s2021_s22, 16 }
  0x54   : > { %867 = vmatprep.subr.bf16.mxu0 %v2716_v29  ;;  %908 = vmatprep.subr.bf16.mxu1 %v2718_v30  ;;  %p2871_p6 = scmp.ne.s32.totalorder %s2021_s22, %s2870_s23  ;;  %p3550_p9 = scmp.ne.s32.totalorder %s3542_s19, 0 }
  0x55   : > { %s2976_s24 = smov [#allocation6]  }
  0x56   : > { %p2872_p10 = pnand %p2871_p6, %p3550_p9  ;;  %s2874_s29 = sshll.u32 %s2976_s24, 4  ;;  %s2875_s29 = int_to_ptr.vmem [resolvable:$false] %s2874_s29 }
  0x57   : > { %868 = vmatpush1.bf16.msra.mxu0 %v2720_v31  ;;  %909 = vmatpush1.bf16.msra.mxu1 %v2721_v32  ;;  %s2876_s14 = scalar_lea.vmem %s2875_s29, 32  ;;  %p2877_p2 = scmp.lt.s32.totalorder %s2021_s22, %s2875_s29 }
  0x58   : > { %935 = vmatprep.subr.bf16.mxu0 %v2724_v34  ;;  %976 = vmatprep.subr.bf16.mxu1 %v2748_v38  ;;  %p2873_p12 = pneg %p2872_p10  ;;  %p2878_p3 = scmp.lt.s32.totalorder %s2876_s14, %s2870_s23 }
  0x5a   : > { %886 = vmatmul.mubr.bf16.vlgmr.msra.gmra.mrb[0].mxu0 %v3118_v35  ;;  %927 = vmatmul.mubr.bf16.vlgmr.msra.gmra.mrb[0].mxu1 %v3118_v35  ;;  %p2879_p4 = por %p2878_p3, %p2877_p2 }
  0x5b   : > { %936 = vmatpush1.bf16.msra.mxu0 %v2722_v36  ;;  %967 = vmatprep.mubr.bf16.mxu0 %v2973_v0 }
  0x5c   : > { %937 = vmatprep.subr.bf16.mxu0 %v2727_v37  ;;  %977 = vmatpush1.bf16.msra.mxu1 %v2746_v39  ;;  %v2778_v39 = vld [vmem:[%s3531_s3] sm:$0xff]   ;;  %p2880_p7 = pnand %p2879_p4, %p2873_p12 }
  0x5d   : > { %1008 = vmatprep.mubr.bf16.mxu1 %v2973_v0  ;;  %978 = vmatprep.subr.bf16.mxu1 %v2751_v40  ;;  %v2769_v0 = vld [vmem:[#allocation2 + $0x214] ss:$36 sps:$4 sm:$0xff]  }
  0x5f   : > { %938 = vmatpush1.bf16.msra.mxu0 %v2725_v41  ;;  %v2779_v41 = vld [vmem:[%s3531_s3 + $0x8] sm:$0xff]  }
  0x60   : > { %939 = vmatprep.subr.bf16.mxu0 %v2730_v42  ;;  %979 = vmatpush1.bf16.msra.mxu1 %v2749_v43  ;;  %v2780_v42 = vld [vmem:[%s3531_s3 + $0x10] sm:$0xff]   ;;  %v2781_v43 = vld [vmem:[%s3531_s3 + $0x18] sm:$0xff]  }
  0x61   : > { %980 = vmatprep.subr.bf16.mxu1 %v2754_v44  ;;  %v2782_v44 = vld [vmem:[%s3531_s3 + $0x20] sm:$0xff]  }
  0x63   : > { %940 = vmatpush1.bf16.msra.mxu0 %v2728_v45  ;;  %v2783_v45 = vld [vmem:[%s3531_s3 + $0x28] sm:$0xff]  }
  0x64   : > { %941 = vmatprep.subr.bf16.mxu0 %v2733_v46  ;;  %981 = vmatpush1.bf16.msra.mxu1 %v2752_v47  ;;  %v458_v46 = vsub.s32 4, %v3164_v13  ;;  %v2784_v47 = vld [vmem:[%s3531_s3 + $0x30] sm:$0xff]  }
  0x65   : > { %982 = vmatprep.subr.bf16.mxu1 %v2757_v48 }
  0x66   : > { %v459_v48 = vrot.slane %v3171_v16, %v458_v46  ;;  %v2815_v46 = vld [vmem:[%s3533_s5 + $0x8] sm:$0xff]  }
  0x67   : > { %942 = vmatpush1.bf16.msra.mxu0 %v2731_v49 }
  0x68   : > { %943 = vmatprep.subr.bf16.mxu0 %v2736_v50  ;;  %983 = vmatpush1.bf16.msra.mxu1 %v2755_v52  ;;  %v2785_v50 = vld [vmem:[%s3531_s3 + $0x38] sm:$0xff]  }
  0x69   : > { %984 = vmatprep.subr.bf16.mxu1 %v2760_v53 }
  0x6b   : > { %944 = vmatpush1.bf16.msra.mxu0 %v2734_v51 }
  0x6c   : > { %945 = vmatprep.subr.bf16.mxu0 %v2739_v54  ;;  %985 = vmatpush1.bf16.msra.mxu1 %v2758_v55 }
  0x6d   : > { %986 = vmatprep.subr.bf16.mxu1 %v2763_v57 }
  0x6f   : > { %946 = vmatpush1.bf16.msra.mxu0 %v2737_v56 }
  0x70   : > { %947 = vmatprep.subr.bf16.mxu0 %v2742_v58  ;;  %987 = vmatpush1.bf16.msra.mxu1 %v2761_v59  ;;  %v2786_v58 = vld [vmem:[%s3531_s3 + $0x80] sm:$0xff]  }
  0x71   : > { %988 = vmatprep.subr.bf16.mxu1 %v2766_v60 }
  0x73   : > { %948 = vmatpush1.bf16.msra.mxu0 %v2740_v61 }
  0x74   : > { %949 = vmatprep.subr.bf16.mxu0 %v2745_v62  ;;  %989 = vmatpush1.bf16.msra.mxu1 %v2764_v63  ;;  %v2787_v62 = vld [vmem:[%s3531_s3 + $0x88] sm:$0xff]   ;;  %v2788_v63 = vld [vmem:[%s3531_s3 + $0x90] sm:$0xff]  }
  0x75   : > { %990 = vmatprep.subr.bf16.mxu1 %v2769_v0  ;;  %v2789_v0 = vld [vmem:[%s3531_s3 + $0x98] sm:$0xff]  }
  0x77   : > { %950 = vmatpush1.bf16.msra.mxu0 %v2743_v1  ;;  %v2790_v1 = vld [vmem:[%s3531_s3 + $0xa0] sm:$0xff]  }
  0x78   : > { %2422 = vmatprep.subr.bf16.mxu0 %v2974_v4  ;;  %991 = vmatpush1.bf16.msra.mxu1 %v2767_v2  ;;  %v2791_v2 = vld [vmem:[%s3531_s3 + $0xa8] sm:$0xff]  }
  0x79   : > { %2442 = vmatprep.subr.bf16.mxu1 %v2974_v4 }
  0x7a   : > { %968 = vmatmul.mubr.bf16.vlgmr.msra.gmra.mrb[4].mxu0 %v3118_v35 }
  0x7b   : > { %1009 = vmatmul.mubr.bf16.vlgmr.msra.gmra.mrb[4].mxu1 %v3118_v35  ;;  %2438 = vmatprep.mubr.msk.bf16.mxu0 %vm2975_vm0, %v2974_v4 }
  0x7c   : > { %2443 = vmatpush3.bf16.msra.mxu1 %v2770_v3  ;;  %2458 = vmatprep.mubr.msk.bf16.mxu1 %vm2975_vm0, %v2974_v4  ;;  %v2792_v3 = vld [vmem:[%s3531_s3 + $0xb0] sm:$0xff]  }
  0x7d   : > { %2444 = vmatprep.subr.bf16.mxu1 %v2974_v4  ;;  %2423 = vmatpush3.bf16.msra.mxu0 %v2802_v18  ;;  %v462_v18 = vsub.s32 5, %v3164_v13 }
  0x7e   : > { %2424 = vmatprep.subr.bf16.mxu0 %v2974_v4 }
  0x80   : > { %2445 = vmatpush3.bf16.msra.mxu1 %v2771_v5  ;;  %v2793_v5 = vld [vmem:[%s3531_s3 + $0xb8] sm:$0xff]  }
  0x81   : > { %2446 = vmatprep.subr.bf16.mxu1 %v2974_v4 }
  0x84   : > { %2447 = vmatpush3.bf16.msra.mxu1 %v2772_v6  ;;  %v2794_v6 = vld [vmem:[%s3531_s3 + $0xc0] sm:$0xff]  }
  0x85   : > { %2448 = vmatprep.subr.bf16.mxu1 %v2974_v4 }
  0x88   : > { %2449 = vmatpush3.bf16.msra.mxu1 %v2773_v7 }
  0x89   : > { %2450 = vmatprep.subr.bf16.mxu1 %v2974_v4 }
  0x8c   : > { %2451 = vmatpush3.bf16.msra.mxu1 %v2774_v8  ;;  %v2795_v8 = vld [vmem:[%s3531_s3 + $0xc8] sm:$0xff]  }
  0x8d   : > { %2452 = vmatprep.subr.bf16.mxu1 %v2974_v4 }
  0x90   : > { %2453 = vmatpush3.bf16.msra.mxu1 %v2775_v9  ;;  %v2796_v9 = vld [vmem:[%s3531_s3 + $0xd0] sm:$0xff]  }
  0x91   : > { %2454 = vmatprep.subr.bf16.mxu1 %v2974_v4 }
  0x94   : > { %2455 = vmatpush3.bf16.msra.mxu1 %v2776_v10  ;;  %v2797_v10 = vld [vmem:[%s3531_s3 + $0xd8] sm:$0xff]  }
  0x95   : > { %2456 = vmatprep.subr.bf16.mxu1 %v2974_v4 }
  0x98   : > { %2457 = vmatpush3.bf16.msra.mxu1 %v2777_v11  ;;  %v2798_v11 = vld [vmem:[%s3531_s3 + $0xe0] sm:$0xff]  }
  0x99   : > { %2462 = vmatprep.subr.bf16.mxu1 %v2974_v4 }
 0x12d   : > { %v887_v23 = vpop.f32.mrb[0].mxu0  ;;  %v928_v24 = vpop.f32.mrb[0].mxu1 }
 0x12e   : > { %v888_v25 = vadd.f32 %v887_v23, %v443_v19  ;;  %v929_v26 = vadd.f32 %v928_v24, %v451_v20  ;;  %v889_v27 = vpop.f32.mrb[1].mxu0  ;;  %v930_v28 = vpop.f32.mrb[1].mxu1  ;;  %v2803_v19 = vld [vmem:[#allocation2 + $0x68] ss:$36 sps:$4 sm:$0xff]   ;;  %v2804_v20 = vld [vmem:[#allocation2 + $0xb0] ss:$36 sps:$4 sm:$0xff]  }
 0x12f   : > { %v890_v29 = vadd.f32 %v889_v27, %v447_v21  ;;  %v931_v30 = vadd.f32 %v930_v28, %v455_v22  ;;  %v891_v31 = vpop.f32.mrb[2].mxu0  ;;  %v932_v32 = vpop.f32.mrb[2].mxu1  ;;  %2425 = vmatpush3.bf16.msra.mxu0 %v2803_v19  ;;  %v2805_v21 = vld [vmem:[#allocation2 + $0xf8] ss:$36 sps:$4 sm:$0xff]   ;;  %v2806_v22 = vld [vmem:[#allocation2 + $0x140] ss:$36 sps:$4 sm:$0xff]   ;;  %v463_v19 = vrot.slane %v3171_v16, %v462_v18 }
 0x130   : > { %v1075_v33 = vmul.f32 %v929_v26, %v888_v25  ;;  %v892_v34 = vpop.f32.mrb[3].mxu0  ;;  %v933_v36 = vpop.f32.mrb[3].mxu1  ;;  %2426 = vmatprep.subr.bf16.mxu0 %v2974_v4  ;;  %v2807_v23 = vld [vmem:[#allocation2 + $0x188] ss:$36 sps:$4 sm:$0xff]   ;;  %v2808_v24 = vld [vmem:[#allocation2 + $0x1d0] ss:$36 sps:$4 sm:$0xff]  }
 0x131   : > { %v1057_v37 = vmul.f32 %v890_v29, %v888_v25  ;;  %v3179_v38 = vmul.f32 %v931_v30, %v888_v25  ;;  %v2810_v31 = vld [vmem:[%s3532_s4] sm:$0xff]   ;;  %v2812_v32 = vld [vmem:[%s3532_s4 + $0x10] sm:$0xff]  }
 0x132   : > { %v1076_v40 = vpack.c.bf16 %v1075_v33, %v1075_v33  ;;  %v2813_v33 = vld [vmem:[%s3532_s4 + $0x18] sm:$0xff]  }
 0x133   : > { %v1058_v60 = vpack.c.bf16 %v1057_v37, %v1057_v37  ;;  %v1271_v7 = vpack.c.bf16 %v3179_v38, %v3179_v38  ;;  %2427 = vmatpush3.bf16.msra.mxu0 %v2804_v20 }
 0x134   : > { %2459 = vmatmul.mubr.bf16.vlgmr.msra.gmra.mrb[8].mxu1 %v1076_v40  ;;  %2428 = vmatprep.subr.bf16.mxu0 %v2974_v4 }
 0x135   : > { %2463 = vmatpush3.bf16.msra.mxu1 %v2778_v39  ;;  %2478 = vmatprep.mubr.msk.bf16.mxu1 %vm2975_vm0, %v2974_v4 }
 0x136   : > { %2464 = vmatprep.subr.bf16.mxu1 %v2974_v4 }
 0x137   : > { %2429 = vmatpush3.bf16.msra.mxu0 %v2805_v21 }
 0x138   : > { %2430 = vmatprep.subr.bf16.mxu0 %v2974_v4 }
 0x139   : > { %2465 = vmatpush3.bf16.msra.mxu1 %v2779_v41 }
 0x13a   : > { %2466 = vmatprep.subr.bf16.mxu1 %v2974_v4 }
 0x13b   : > { %2431 = vmatpush3.bf16.msra.mxu0 %v2806_v22 }
 0x13c   : > { %2432 = vmatprep.subr.bf16.mxu0 %v2974_v4 }
 0x13d   : > { %2467 = vmatpush3.bf16.msra.mxu1 %v2780_v42 }
 0x13e   : > { %2468 = vmatprep.subr.bf16.mxu1 %v2974_v4 }
 0x13f   : > { %2433 = vmatpush3.bf16.msra.mxu0 %v2807_v23 }
 0x140   : > { %2434 = vmatprep.subr.bf16.mxu0 %v2974_v4 }
 0x141   : > { %2469 = vmatpush3.bf16.msra.mxu1 %v2781_v43 }
 0x142   : > { %2470 = vmatprep.subr.bf16.mxu1 %v2974_v4 }
 0x143   : > { %2435 = vmatpush3.bf16.msra.mxu0 %v2808_v24 }
 0x144   : > { %2436 = vmatprep.subr.bf16.mxu0 %v2974_v4 }
 0x145   : > { %2471 = vmatpush3.bf16.msra.mxu1 %v2782_v44 }
 0x146   : > { %2472 = vmatprep.subr.bf16.mxu1 %v2974_v4 }
 0x149   : > { %2473 = vmatpush3.bf16.msra.mxu1 %v2783_v45  ;;  %v2814_v45 = vld [vmem:[%s3533_s5] sm:$0xff]  }
 0x14a   : > { %2474 = vmatprep.subr.bf16.mxu1 %v2974_v4 }
 0x14d   : > { %2475 = vmatpush3.bf16.msra.mxu1 %v2784_v47  ;;  %v969_v49 = vpop.f32.mrb[4].mxu0  ;;  %v2816_v47 = vld [vmem:[%s3533_s5 + $0x10] sm:$0xff]  }
 0x14e   : > { %v970_v51 = vadd.f32 %v969_v49, %v459_v48  ;;  %2476 = vmatprep.subr.bf16.mxu1 %v2974_v4  ;;  %v3216_v52 = vpop.f32.mrb[5].mxu0  ;;  %v3218_v54 = vpop.f32.mrb[4].mxu1  ;;  %v2817_v48 = vld [vmem:[%s3533_s5 + $0x18] sm:$0xff]  }
 0x14f   : > { %v973_v53 = vpop.f32.mrb[6].mxu0  ;;  %v3220_v57 = vpop.f32.mrb[5].mxu1  ;;  %v972_v20 = vadd.f32 %v3216_v52, %v463_v19 }
 0x150   : > { %v1378_v55 = vmul.f32 %v970_v51, %v888_v25  ;;  %v974_v56 = vpop.f32.mrb[7].mxu0  ;;  %v1014_v59 = vpop.f32.mrb[6].mxu1  ;;  %v2809_v25 = vld [vmem:[#allocation2 + $0x218] ss:$36 sps:$4 sm:$0xff]  }
 0x151   : > { %2477 = vmatpush3.bf16.msra.mxu1 %v2785_v50  ;;  %v1015_v61 = vpop.f32.mrb[7].mxu1  ;;  %2437 = vmatpush3.bf16.msra.mxu0 %v2809_v25 }
 0x152   : > { %2482 = vmatprep.subr.bf16.mxu1 %v2974_v4  ;;  %v1379_v17 = vpack.c.bf16 %v1378_v55, %v1378_v55  ;;  %2522 = vmatprep.subr.bf16.mxu0 %v2974_v4  ;;  %v2820_v61 = vld [vmem:[%s3533_s5 + $0x30] sm:$0xff]  }
 0x154   : > { %2479 = vmatmul.mubr.bf16.vlgmr.msra.gmra.mrb[8].mxu1 %v1058_v60  ;;  %2439 = vmatmul.mubr.bf16.vlgmr.msra.gmra.mrb[8].mxu0 %v3118_v35  ;;  %v2811_v35 = vld [vmem:[%s3532_s4 + $0x8] sm:$0xff]  }
 0x155   : > { %2483 = vmatpush3.bf16.msra.mxu1 %v2786_v58  ;;  %2498 = vmatprep.mubr.msk.bf16.mxu1 %vm2975_vm0, %v2974_v4  ;;  %v2818_v58 = vld [vmem:[%s3533_s5 + $0x20] sm:$0xff]   ;;  %v2819_v60 = vld [vmem:[%s3533_s5 + $0x28] sm:$0xff]  }
 0x156   : > { %2484 = vmatprep.subr.bf16.mxu1 %v2974_v4  ;;  %2530 = vmatprep.mubr.msk.bf16.mxu0 %vm2975_vm0, %v2974_v4 }
 0x157   : > { %2523 = vmatpush3.bf16.msra.mxu0 %v2810_v31 }
 0x158   : > { %2524 = vmatprep.subr.bf16.mxu0 %v2974_v4 }
 0x159   : > { %2485 = vmatpush3.bf16.msra.mxu1 %v2787_v62  ;;  %v2821_v62 = vld [vmem:[%s3533_s5 + $0x38] sm:$0xff]  }
 0x15a   : > { %2486 = vmatprep.subr.bf16.mxu1 %v2974_v4 }
 0x15b   : > { %2525 = vmatpush3.bf16.msra.mxu0 %v2811_v35 }
 0x15c   : > { %2526 = vmatprep.subr.bf16.mxu0 %v2974_v4 }
 0x15d   : > { %2487 = vmatpush3.bf16.msra.mxu1 %v2788_v63  ;;  %v2822_v63 = vld [vmem:[%s3533_s5 + $0x40] sm:$0xff]  }
 0x15e   : > { %2488 = vmatprep.subr.bf16.mxu1 %v2974_v4 }
 0x15f   : > { %2527 = vmatpush3.bf16.msra.mxu0 %v2812_v32 }
 0x160   : > { %2528 = vmatprep.subr.bf16.mxu0 %v2974_v4 }
 0x161   : > { %2489 = vmatpush3.bf16.msra.mxu1 %v2789_v0  ;;  %v2823_v0 = vld [vmem:[%s3533_s5 + $0x48] sm:$0xff]  }
 0x162   : > { %2490 = vmatprep.subr.bf16.mxu1 %v2974_v4 }
 0x163   : > { %2529 = vmatpush3.bf16.msra.mxu0 %v2813_v33  ;;  %v470_v33 = vsub.s32 7, %v3164_v13 }
 0x164   : > { %2534 = vmatprep.subr.bf16.mxu0 %v2974_v4 }
 0x165   : > { %2491 = vmatpush3.bf16.msra.mxu1 %v2790_v1  ;;  %v2824_v1 = vld [vmem:[%s3533_s5 + $0x50] sm:$0xff]   ;;  %v471_v52 = vrot.slane %v3171_v16, %v470_v33 }
 0x166   : > { %2492 = vmatprep.subr.bf16.mxu1 %v2974_v4 }
 0x169   : > { %2493 = vmatpush3.bf16.msra.mxu1 %v2791_v2  ;;  %v2825_v2 = vld [vmem:[%s3533_s5 + $0x58] sm:$0xff]  }
 0x16a   : > { %2494 = vmatprep.subr.bf16.mxu1 %v2974_v4 }
 0x16d   : > { %2495 = vmatpush3.bf16.msra.mxu1 %v2792_v3  ;;  %v2826_v3 = vld [vmem:[%s3533_s5 + $0x60] sm:$0xff]  }
 0x16e   : > { %2496 = vmatprep.subr.bf16.mxu1 %v2974_v4 }
 0x171   : > { %2497 = vmatpush3.bf16.msra.mxu1 %v2793_v5  ;;  %v2827_v5 = vld [vmem:[%s3533_s5 + $0x68] sm:$0xff]  }
 0x172   : > { %2502 = vmatprep.subr.bf16.mxu1 %v2974_v4 }
 0x174   : > { %2499 = vmatmul.mubr.bf16.vlgmr.msra.gmra.mrb[8].mxu1 %v1271_v7  ;;  %v2829_v7 = vld [vmem:[%s3533_s5 + $0x78] sm:$0xff]  }
 0x175   : > { %2503 = vmatpush3.bf16.msra.mxu1 %v2794_v6  ;;  %2518 = vmatprep.mubr.msk.bf16.mxu1 %vm2975_vm0, %v2974_v4  ;;  %v2828_v6 = vld [vmem:[%s3533_s5 + $0x70] sm:$0xff]  }
 0x176   : > { %2504 = vmatprep.subr.bf16.mxu1 %v2974_v4 }
 0x179   : > { %2505 = vmatpush3.bf16.msra.mxu1 %v2795_v8  ;;  %v2830_v8 = vld [vmem:[%s3534_s6] sm:$0xff]  }
 0x17a   : > { %2506 = vmatprep.subr.bf16.mxu1 %v2974_v4 }
 0x17d   : > { %2507 = vmatpush3.bf16.msra.mxu1 %v2796_v9  ;;  %v2831_v9 = vld [vmem:[%s3534_s6 + $0x8] sm:$0xff]  }
 0x17e   : > { %2508 = vmatprep.subr.bf16.mxu1 %v2974_v4 }
 0x181   : > { %2509 = vmatpush3.bf16.msra.mxu1 %v2797_v10  ;;  %v2832_v10 = vld [vmem:[%s3534_s6 + $0x10] sm:$0xff]  }
 0x182   : > { %2510 = vmatprep.subr.bf16.mxu1 %v2974_v4 }
 0x185   : > { %2511 = vmatpush3.bf16.msra.mxu1 %v2798_v11  ;;  %v2833_v11 = vld [vmem:[%s3534_s6 + $0x18] sm:$0xff]  }
 0x186   : > { %2512 = vmatprep.subr.bf16.mxu1 %v2974_v4 }
 0x189   : > { %2513 = vmatpush3.bf16.msra.mxu1 %v2799_v12  ;;  %v2834_v12 = vld [vmem:[%s3534_s6 + $0x20] sm:$0xff]  }
 0x18a   : > { %2514 = vmatprep.subr.bf16.mxu1 %v2974_v4 }
 0x18d   : > { %2515 = vmatpush3.bf16.msra.mxu1 %v2800_v14  ;;  %v2835_v14 = vld [vmem:[%s3534_s6 + $0x28] sm:$0xff]  }
 0x18e   : > { %2516 = vmatprep.subr.bf16.mxu1 %v2974_v4 }
 0x191   : > { %2517 = vmatpush3.bf16.msra.mxu1 %v2801_v15  ;;  %v2836_v15 = vld [vmem:[%s3534_s6 + $0x30] sm:$0xff]  }
 0x194   : > { %2519 = vmatmul.mubr.bf16.vlgmr.msra.gmra.mrb[8].mxu1 %v1379_v17  ;;  %v2837_v17 = vld [vmem:[%s3534_s6 + $0x38] sm:$0xff]  }
 0x227   : > { %v3320_v34 = vpop.f32.mrb[8].mxu0 }
 0x228   : > { %v2440_v36 = vpop.f32.mrb[9].mxu0 }
 0x229   : > { %v1054_v37 = vpop.f32.mrb[10].mxu0  ;;  %v1013_v36 = vadd.f32 %v3220_v57, %v471_v52 }
 0x22a   : > { %v2441_v38 = vpop.f32.mrb[11].mxu0 }
 0x267   : > { %v1479_v26 = vpop.f32.mrb[8].mxu1 }
 0x268   : > { %v2520_v27 = vpop.f32.mrb[9].mxu1  ;;  %v1487_v28 = vsel %vm1486_vm1, %v1479_v26, -inf }
 0x269   : > { %v1482_v29 = vpop.f32.mrb[10].mxu1  ;;  %1488 = vmax.xlane.f32.xlu0 %v1487_v28 }
 0x26a   : > { %v2521_v30 = vpop.f32.mrb[11].mxu1 }
 0x2f6   : > { %v1489_v39 = vpop.xlane.xlu0 %1488 }
 0x2f7   : > { %v1490_v40 = vsub.f32 %v1479_v26, %v1489_v39  ;;  %v466_v26 = vsub.s32 6, %v3164_v13 }
 0x2f9   : > { %v1491_v41 = vmax.f32 %v1490_v40, -60.0 }
 0x2fb   : > { %v1492_v42 = vmul.f32 1.442695, %v1491_v41 }
 0x2fd   : > { %2838 = vpow2.f32 %v1492_v42  ;;  %v2127_v42 = vld [vmem:[%s3530_s2 + $0x8] ss:$0 sm:$0xff] }
 0x307   : > { %v2839_v43 = vpop.eup %2838 }
 0x308   : > { %v1494_v44 = vpack.c.bf16 %v2839_v43, %v2839_v43 }
 0x30a   : > { %2531 = vmatmul.mubr.msk.bf16.vlgmr.msra.gmra.mrb[12].mxu0 %vm1486_vm1, %v1494_v44 }
 0x30b   : > { %2542 = vmatprep.mubr.msk.bf16.mxu0 %vm2975_vm0, %v2974_v4  ;;  %2535 = vmatpush3.bf16.msra.mxu0 %v2814_v45 }
 0x30c   : > { %2536 = vmatprep.subr.bf16.mxu0 %v2974_v4 }
 0x30f   : > { %2537 = vmatpush3.bf16.msra.mxu0 %v2815_v46 }
 0x310   : > { %2538 = vmatprep.subr.bf16.mxu0 %v2974_v4 }
 0x313   : > { %2539 = vmatpush3.bf16.msra.mxu0 %v2816_v47 }
 0x314   : > { %2540 = vmatprep.subr.bf16.mxu0 %v2974_v4 }
 0x317   : > { %2541 = vmatpush3.bf16.msra.mxu0 %v2817_v48 }
 0x318   : > { %2546 = vmatprep.subr.bf16.mxu0 %v2974_v4 }
 0x3dd   : > { %v1564_v49 = vpop.f32.mrb[12].mxu0 }
 0x3de   : > { %2840 = vrcp.f32 %v1564_v49  ;;  %v2532_v50 = vpop.f32.mrb[13].mxu0 }
 0x3df   : > { %v1567_v51 = vpop.f32.mrb[14].mxu0 }
 0x3e0   : > { %v2533_v53 = vpop.f32.mrb[15].mxu0 }
 0x3e8   : > { %v2841_v55 = vpop.eup %2840 }
 0x3e9   : > { %v1571_v56 = vmul.f32 %v2841_v55, %v2839_v43  ;;  %v1052_v43 = vadd.f32 %v2127_v42, %v3320_v34 }
 0x3eb   : > { %v1572_v59 = vpack.c.bf16 %v1571_v56, %v1571_v56  ;;  %1988 = vst.msk [vmem:[%s348_s16 - $0x7] sm:$0x80] %vm1987_vm2, %v1571_v56 }
 0x3ed   : > { %2543 = vmatmul.mubr.msk.bf16.vlgmr.msra.gmra.mrb[16].mxu0 %vm1486_vm1, %v1572_v59 }
 0x3ee   : > { %2547 = vmatpush3.bf16.msra.mxu0 %v2818_v58  ;;  %2554 = vmatprep.mubr.msk.bf16.mxu0 %vm2975_vm0, %v2974_v4 }
 0x3ef   : > { %2548 = vmatprep.subr.bf16.mxu0 %v2974_v4 }
 0x3f2   : > { %2549 = vmatpush3.bf16.msra.mxu0 %v2819_v60 }
 0x3f3   : > { %2550 = vmatprep.subr.bf16.mxu0 %v2974_v4 }
 0x3f6   : > { %2551 = vmatpush3.bf16.msra.mxu0 %v2820_v61 }
 0x3f7   : > { %2552 = vmatprep.subr.bf16.mxu0 %v2974_v4 }
 0x3fa   : > { %2553 = vmatpush3.bf16.msra.mxu0 %v2821_v62 }
 0x3fb   : > { %2558 = vmatprep.subr.bf16.mxu0 %v2974_v4 }
 0x3fd   : > { %2555 = vmatmul.mubr.msk.bf16.vlgmr.msra.gmra.mrb[20].mxu0 %vm1486_vm1, %v1572_v59 }
 0x3fe   : > { %2559 = vmatpush3.bf16.msra.mxu0 %v2822_v63  ;;  %2566 = vmatprep.mubr.msk.bf16.mxu0 %vm2975_vm0, %v2974_v4 }
 0x3ff   : > { %2560 = vmatprep.subr.bf16.mxu0 %v2974_v4 }
 0x402   : > { %2561 = vmatpush3.bf16.msra.mxu0 %v2823_v0 }
 0x403   : > { %2562 = vmatprep.subr.bf16.mxu0 %v2974_v4 }
 0x406   : > { %2563 = vmatpush3.bf16.msra.mxu0 %v2824_v1 }
 0x407   : > { %2564 = vmatprep.subr.bf16.mxu0 %v2974_v4 }
 0x40a   : > { %2565 = vmatpush3.bf16.msra.mxu0 %v2825_v2 }
 0x40b   : > { %2570 = vmatprep.subr.bf16.mxu0 %v2974_v4 }
 0x40d   : > { %2567 = vmatmul.mubr.msk.bf16.vlgmr.msra.gmra.mrb[24].mxu0 %vm1486_vm1, %v1572_v59 }
 0x40e   : > { %2571 = vmatpush3.bf16.msra.mxu0 %v2826_v3  ;;  %2578 = vmatprep.mubr.msk.bf16.mxu0 %vm2975_vm0, %v2974_v4 }
 0x40f   : > { %2572 = vmatprep.subr.bf16.mxu0 %v2974_v4 }
 0x412   : > { %2573 = vmatpush3.bf16.msra.mxu0 %v2827_v5 }
 0x413   : > { %2574 = vmatprep.subr.bf16.mxu0 %v2974_v4 }
 0x416   : > { %2575 = vmatpush3.bf16.msra.mxu0 %v2828_v6 }
 0x417   : > { %2576 = vmatprep.subr.bf16.mxu0 %v2974_v4 }
 0x41a   : > { %2577 = vmatpush3.bf16.msra.mxu0 %v2829_v7 }
 0x41b   : > { %2582 = vmatprep.subr.bf16.mxu0 %v2974_v4 }
 0x41d   : > { %2579 = vmatmul.mubr.msk.bf16.vlgmr.msra.gmra.mrb[28].mxu0 %vm1486_vm1, %v1572_v59 }
 0x41e   : > { %2598 = vmatprep.mubr.msk.bf16.mxu0 %vm2975_vm0, %v2974_v4  ;;  %2583 = vmatpush3.bf16.msra.mxu0 %v2830_v8 }
 0x41f   : > { %2584 = vmatprep.subr.bf16.mxu0 %v2974_v4 }
 0x422   : > { %2585 = vmatpush3.bf16.msra.mxu0 %v2831_v9 }
 0x423   : > { %2586 = vmatprep.subr.bf16.mxu0 %v2974_v4 }
 0x426   : > { %2587 = vmatpush3.bf16.msra.mxu0 %v2832_v10 }
 0x427   : > { %2588 = vmatprep.subr.bf16.mxu0 %v2974_v4 }
 0x42a   : > { %2589 = vmatpush3.bf16.msra.mxu0 %v2833_v11 }
 0x42b   : > { %2590 = vmatprep.subr.bf16.mxu0 %v2974_v4 }
 0x42e   : > { %2591 = vmatpush3.bf16.msra.mxu0 %v2834_v12 }
 0x42f   : > { %2592 = vmatprep.subr.bf16.mxu0 %v2974_v4 }
 0x432   : > { %2593 = vmatpush3.bf16.msra.mxu0 %v2835_v14 }
 0x433   : > { %2594 = vmatprep.subr.bf16.mxu0 %v2974_v4 }
 0x436   : > { %2595 = vmatpush3.bf16.msra.mxu0 %v2836_v15 }
 0x437   : > { %2596 = vmatprep.subr.bf16.mxu0 %v2974_v4  ;;  %v467_v4 = vrot.slane %v3171_v16, %v466_v26 }
 0x439   : > { %v1011_v27 = vadd.f32 %v3218_v54, %v467_v4 }
 0x43a   : > { %2597 = vmatpush3.bf16.msra.mxu0 %v2837_v17 }
 0x4c0   : > { %v1642_v21 = vpop.f32.mrb[16].mxu0 }
 0x4c1   : > { %v1648_v22 = vmul.f32 %v1642_v21, %v972_v20  ;;  %v2544_v23 = vpop.f32.mrb[17].mxu0 }
 0x4c2   : > { %v1645_v24 = vpop.f32.mrb[18].mxu0 }
 0x4c3   : > { %v2545_v25 = vpop.f32.mrb[19].mxu0 }
 0x4d0   : > { %v1716_v28 = vpop.f32.mrb[20].mxu0 }
 0x4d1   : > { %v1722_v29 = vmul.f32 %v1716_v28, %v1011_v27  ;;  %v2556_v30 = vpop.f32.mrb[21].mxu0 }
 0x4d2   : > { %v1719_v31 = vpop.f32.mrb[22].mxu0 }
 0x4d3   : > { %v1723_v35 = vadd.f32 %v1722_v29, %v1648_v22  ;;  %v2557_v32 = vpop.f32.mrb[23].mxu0 }
 0x4e0   : > { %v1791_v37 = vpop.f32.mrb[24].mxu0 }
 0x4e1   : > { %v1797_v38 = vmul.f32 %v1791_v37, %v1013_v36  ;;  %v2568_v39 = vpop.f32.mrb[25].mxu0 }
 0x4e2   : > { %v1794_v40 = vpop.f32.mrb[26].mxu0 }
 0x4e3   : > { %v1798_v41 = vadd.f32 %v1797_v38, %v1723_v35  ;;  %v2569_v54 = vpop.f32.mrb[27].mxu0 }
 0x4f0   : > { %v1866_v13 = vpop.f32.mrb[28].mxu0 }
 0x4f1   : > { %v1872_v16 = vmul.f32 %v1866_v13, %v1052_v43  ;;  %v2580_v44 = vpop.f32.mrb[29].mxu0 }
 0x4f2   : > { %v1869_v57 = vpop.f32.mrb[30].mxu0 }
 0x4f3   : > { %v1873_v45 = vadd.f32 %v1872_v16, %v1798_v41  ;;  %v2581_v46 = vpop.f32.mrb[31].mxu0 }
 0x4f5   : > { %v1874_v47 = vpack.c.bf16 %v1873_v45, %v1873_v45 }
 0x4f7   : > { %2599 = vmatmul.mubr.bf16.vlgmr.msra.gmra.mrb[32].mxu0 %v1874_v47 }
 0x4f8   : > { %2883 = shalt.err (!%p2880_p7)
}
 0x4f9   : > { %s2884_s16 = scalar_lea.hbm %s3457_s28, 16  ;;  %s2888_s26 = scalar_lea.hbm %s3537_s9, 32 }
 0x4fa   : > { %p2885_p8 = scmp.ne.s32.totalorder %s3457_s28, %s2884_s16  ;;  %p2889_p1 = scmp.lt.u32.totalorder %s3457_s28, %s3537_s9 }
 0x4fb   : > { %p2890_p0 = scmp.lt.u32.totalorder %s2888_s26, %s2884_s16  ;;  %p2892_p6 = scmp.lt.u32.totalorder %s2884_s16, %s3457_s28 }
 0x4fc   : > { %p2886_p11 = pnand %p2885_p8, %p3550_p9 }
 0x4fd   : > { %p2891_p5 = por %p2890_p0, %p2889_p1 }
 0x4fe   : > { %p2887_p13 = pneg %p2886_p11 }
 0x4ff   : > { %p2893_p10 = por %p2892_p6, %p2891_p5 }
 0x501   : > { %p2894_p12 = pnand %p2893_p10, %p2887_p13 }
 0x503   : > { %2897 = shalt.err (!%p2894_p12)
}
 0x504   : > { %2619 = dma.vmem_to_hbm [thread:$0]  (%p3550_p9), %s2021_s22, 16, %s3457_s28, %s1995_s21   ;;  %v2329_v34 = vld [vmem:[%s3535_s7] ss:$0 sm:$0xff] }
 0x505   : > { %s2125_s23 = sshll.u32 %s3342_s27, 3  ;;  %s2339_s25 = sshll.u32 %s3049_s13, 7 }
 0x506   : > { %s342_s26 = scalar_lea.vmem [#allocation5], %s2125_s23  ;;  %s3485_s0 = scalar_lea.hbm %s3536_s8, %s2339_s25 }
 0x507   : > { %s2007_s24 = sshll.u32 %s342_s26, 4  ;;  %s1990_s22 = scalar_lea.sflag [#allocation4], %s3342_s27  ;;  %s3487_s24 = int_to_ptr.vmem [resolvable:$true] %s2007_s24 }
 0x508   : > { %s2898_s13 = scalar_lea.vmem %s3487_s24, 128  ;;  %s2977_s28 = smov [#allocation5]  }
 0x509   : > { %p2899_p2 = scmp.ne.s32.totalorder %s3487_s24, %s2898_s13  ;;  %s2902_s21 = sshll.u32 %s2977_s28, 4  ;;  %s2903_s21 = int_to_ptr.vmem [resolvable:$false] %s2902_s21 }
 0x50a   : > { %s2904_s23 = scalar_lea.vmem %s2903_s21, 256  ;;  %p2905_p7 = scmp.lt.s32.totalorder %s3487_s24, %s2903_s21 }
 0x50b   : > { %p2900_p3 = pnand %p2899_p2, %p3550_p9  ;;  %p2906_p8 = scmp.lt.s32.totalorder %s2904_s23, %s2898_s13 }
 0x50d   : > { %p2901_p4 = pneg %p2900_p3  ;;  %p2907_p11 = por %p2906_p8, %p2905_p7 }
 0x50f   : > { %p2908_p13 = pnand %p2907_p11, %p2901_p4 }
 0x5ca   : > { %v1980_v48 = vpop.f32.mrb[32].mxu0 }
 0x5cb   : > { %v1981_v49 = vadd.f32 %v2329_v34, %v1980_v48  ;;  %v2600_v50 = vpop.f32.mrb[33].mxu0 }
 0x5cc   : > { %v1983_v51 = vpop.f32.mrb[34].mxu0 }
 0x5cd   : > { %1986 = vst [vmem:[%s342_s26] sm:$0xff] %v1981_v49  ;;  %v2601_v53 = vpop.f32.mrb[35].mxu0 }
 0x5ce   : > { %2911 = shalt.err (!%p2908_p13)
}
 0x5cf   : > { %s2912_s27 = scalar_lea.hbm %s3485_s0, 128  ;;  %s2916_s25 = scalar_lea.hbm %s3536_s8, 256 }
 0x5d0   : > { %p2913_p1 = scmp.ne.s32.totalorder %s3485_s0, %s2912_s27  ;;  %p2917_p6 = scmp.lt.u32.totalorder %s3485_s0, %s3536_s8 }
 0x5d1   : > { %p2918_p10 = scmp.lt.u32.totalorder %s2916_s25, %s2912_s27  ;;  %p2920_p2 = scmp.lt.u32.totalorder %s2912_s27, %s3485_s0 }
 0x5d2   : > { %p2914_p0 = pnand %p2913_p1, %p3550_p9 }
 0x5d3   : > { %p2919_p12 = por %p2918_p10, %p2917_p6 }
 0x5d4   : > { %p2915_p5 = pneg %p2914_p0 }
 0x5d5   : > { %p2921_p3 = por %p2920_p2, %p2919_p12 }
 0x5d7   : > { %p2922_p4 = pnand %p2921_p3, %p2915_p5 }
 0x5d9   : > { %2925 = shalt.err (!%p2922_p4)
}
 0x5da   : > { %2618 = dma.vmem_to_hbm [thread:$0]  (%p3550_p9), %s3487_s24, 128, %s3485_s0, %s1990_s22  }
 0x5db PF: > { %p2635_p7 = scmp.ge.s32.totalorder %s2968_s12, 2  ;;  %s2032_s29 = sand.u32 1, %s2956_s30  }
 0x5dc   : > { %p3551_p8 = scmp.ne.s32.totalorder %s3543_s20, 0  ;;  %s2033_s13 = scalar_lea.sflag [#allocation4], %s2032_s29 }
 0x5de   : > { %p2627_p11 = pnand %p2635_p7, %p3551_p8 }
 0x5e0   : > { %2947 = dma.done.wait (!%p2627_p11), %s2033_s13, 128  }
 0x5e1   : > { %2949 = vsyncadd (!%p2627_p11), %s2033_s13, 4294967168  ;;  %s2042_s28 = scalar_lea.sflag [#allocation7], %s2032_s29 }
 0x5e2   : > { %2951 = dma.done.wait (!%p2627_p11), %s2042_s28, 16  }
 0x5e3   : > { %2953 = vsyncadd (!%p2627_p11), %s2042_s28, 4294967280  ;;  %p24_p9 = scmp.ge.s32.totalorder %s3053_s15, 4   ;;  %s3552_s30 = smov %s2960_s10 }
 0x5e4   : > { %s3553_s10 = smov %s2964_s11  ;;  %s3554_s11 = smov %s3064_s18 }
 0x5e5   : > { %s3555_s12 = smov %s3053_s15  ;;  %26 = sbr.rel (!%p24_p9) target bundleno = 8 (0x8), region = 115 }
 0x5ec   :  { %2046 = vsyncpa [#allocation3], 1 }
 0x5ed   :  { %2048 = vsyncpa [#allocation3 + $0x1], 1 }
 0x5ee   :  { %2049 = vsyncpa [#allocation4], 1 }
 0x5ef   :  { %2051 = vsyncpa [#allocation4 + $0x1], 1 }
 0x5f0   :  { %2052 = vsyncpa [#allocation7], 1 }
 0x5f1   :  { %2054 = vsyncpa [#allocation7 + $0x1], 1 }

</bundles_post_ra>
